<compile_context>
chip_gen: v7x
topology: tpu7x:2x2x1
jax: 0.10.0
libtpu: 0.0.40
codegen_flags: <defaults>
</compile_context>

<pallas_src>
import jax
import jax.numpy as jnp
from jax.experimental import pallas as pl
from jax.experimental.pallas import tpu as pltpu

MAT_DIFF_LOSS_SCALE = 0.001
_LANES = 128


def _round_up(x, m):
    return ((x + m - 1) // m) * m


def _loss_kernel(pred0_ref, pred1_ref, tgt_ref, weight_ref, trans_ref,
                 out_ref, num_ref, den_ref):
    i = pl.program_id(0)

    @pl.when(i == 0)
    def _init():
        num_ref[...] = jnp.zeros_like(num_ref)
        den_ref[...] = jnp.zeros_like(den_ref)

    # Scalar class weights straight from SMEM (no (N, C) broadcast).
    w0 = weight_ref[0, 0]
    w1 = weight_ref[0, 1]

    tgt = tgt_ref[...]            # (rows, 128) int32, -1 marks padding
    p0 = pred0_ref[...]           # (rows, 128) log p(class 0)
    p1 = pred1_ref[...]           # (rows, 128) log p(class 1)

    is1 = tgt == 1
    valid = (tgt >= 0).astype(jnp.float32)
    picked_p = jnp.where(is1, p1, p0)          # pred[i, t_i]
    picked_w = jnp.where(is1, w1, w0) * valid  # weight[t_i], 0 for padding

    num_ref[...] += jnp.sum(picked_w * picked_p, keepdims=True)   # (1, 1)
    den_ref[...] += jnp.sum(picked_w, keepdims=True)              # (1, 1)

    @pl.when(i == pl.num_programs(0) - 1)
    def _finalize():
        trans = trans_ref[...]                                    # (B, d, d)
        B, d, _ = trans.shape
        # ||T T^T - I||_F^2 = sum((T T^T)^2) - 2*sum(T^2) + d  (trace identity, no eye)
        prod = jnp.einsum('bij,bkj->bik', trans, trans,
                          preferred_element_type=jnp.float32)     # batched T @ T^T on MXU
        sum_prod2 = jnp.sum(jnp.sum(prod * prod, axis=2, keepdims=True),
                            axis=1, keepdims=True)                # (B, 1, 1)
        sum_t2 = jnp.sum(jnp.sum(trans * trans, axis=2, keepdims=True),
                         axis=1, keepdims=True)                   # (B, 1, 1)
        fro2 = sum_prod2 - 2.0 * sum_t2 + jnp.float32(d)
        norms = jnp.sqrt(jnp.maximum(fro2, 0.0))                  # (B, 1, 1)
        reg = jnp.sum(norms) / B                                  # scalar

        nll = -num_ref[...] / den_ref[...]                        # (1, 1)
        out_ref[...] = nll + reg * MAT_DIFF_LOSS_SCALE


def pointnetpp_loss(pred, trans_feat, target, weight=None, block_rows=1024):
    """pred: (B, Npts, 2) log-probs, trans_feat: (B, d, d), target: (B, Npts) int."""
    if weight is None:
        weight = jnp.ones((2,), dtype=jnp.float32)

    pred2 = pred.reshape(-1, 2).astype(jnp.float32)     # (N, 2)
    tgt = target.reshape(-1).astype(jnp.int32)          # (N,)
    n = pred2.shape[0]

    # Lane-dense layout: pad N up to num_blocks * rows_block * 128 points.
    rows_needed = max(1, -(-n // _LANES))
    rows_block = min(_round_up(rows_needed, 8), _round_up(block_rows, 8))
    num_blocks = -(-rows_needed // rows_block)
    total_rows = num_blocks * rows_block
    pad = total_rows * _LANES - n

    pred0 = jnp.pad(pred2[:, 0], (0, pad)).reshape(total_rows, _LANES)
    pred1 = jnp.pad(pred2[:, 1], (0, pad)).reshape(total_rows, _LANES)
    tgt2d = jnp.pad(tgt, (0, pad), constant_values=-1).reshape(total_rows, _LANES)

    w2 = jnp.asarray(weight, dtype=jnp.float32).reshape(1, 2)
    trans = trans_feat.astype(jnp.float32)
    B, d, _ = trans.shape

    row_spec = pl.BlockSpec((rows_block, _LANES), lambda i: (i, 0))

    out = pl.pallas_call(
        _loss_kernel,
        out_shape=jax.ShapeDtypeStruct((1, 1), jnp.float32),
        grid_spec=pltpu.PrefetchScalarGridSpec(
            num_scalar_prefetch=0,
            grid=(num_blocks,),
            in_specs=[
                row_spec,      # pred0 plane
                row_spec,      # pred1 plane
                row_spec,      # target plane
                pl.BlockSpec((1, 2), lambda i: (0, 0),
                             memory_space=pltpu.MemorySpace.SMEM),   # class weights
                pl.BlockSpec((B, d, d), lambda i: (0, 0, 0)),        # trans_feat (resident)
            ],
            out_specs=pl.BlockSpec((1, 1), lambda i: (0, 0)),
            scratch_shapes=[pltpu.VMEM((1, 1), jnp.float32),   # num accumulator
                            pltpu.VMEM((1, 1), jnp.float32)],  # den accumulator
        ),
        compiler_params=pltpu.CompilerParams(
            dimension_semantics=("arbitrary",)),
    )(pred0, pred1, tgt2d, w2, trans)
    return out[0, 0]


def _reference_loss(pred, trans_feat, target, weight):
    # pure-JAX reference mirroring the PyTorch semantics (explicit eye version)
    pred2 = pred.reshape(-1, 2)
    tgt = target.reshape(-1)
    w_t = weight[tgt]
    picked = pred2[jnp.arange(pred2.shape[0]), tgt]
    nll = -jnp.sum(w_t * picked) / jnp.sum(w_t)
    d = trans_feat.shape[1]
    prod = jnp.einsum('bij,bkj->bik', trans_feat, trans_feat) - jnp.eye(d)[None]
    reg = jnp.mean(jnp.sqrt(jnp.sum(prod * prod, axis=(1, 2))))
    return nll + reg * MAT_DIFF_LOSS_SCALE


if __name__ == "__main__":
    key = jax.random.PRNGKey(0)
    k1, k2, k3 = jax.random.split(key, 3)

    B, NPTS, D = 2, 16, 64
    logits = jax.random.normal(k1, (B, NPTS, 2), dtype=jnp.float32)
    pred = jax.nn.log_softmax(logits, axis=-1)                 # log-probabilities (NLL input)
    target = jax.random.randint(k2, (B, NPTS), 0, 2, dtype=jnp.int32)
    trans_feat = jax.random.normal(k3, (B, D, D), dtype=jnp.float32) * 0.1
    weight = jnp.array([1.0, 1.0], dtype=jnp.float32)

    total = pointnetpp_loss(pred, trans_feat, target, weight)
    total = jax.block_until_ready(total)

    ref = _reference_loss(pred, trans_feat, target, weight)
    assert jnp.allclose(total, ref, rtol=1e-5, atol=1e-5), (total, ref)

    # TODO(synk): forward-only kernel; no custom_vjp, so not usable on the training backward path.
    print("KERNEL_OK")
</pallas_src>

<mosaic_0001>
module attributes {stable_mosaic.version = 11 : i64} {
  func.func @_loss_kernel(%arg0: i32, %arg1: memref<8x128xf32, #tpu.memory_space<vmem>>, %arg2: memref<8x128xf32, #tpu.memory_space<vmem>>, %arg3: memref<8x128xi32, #tpu.memory_space<vmem>>, %arg4: memref<1x2xf32, #tpu.memory_space<smem>>, %arg5: memref<2x64x64xf32, #tpu.memory_space<vmem>>, %arg6: memref<1x1xf32, #tpu.memory_space<vmem>>, %arg7: memref<1x1xf32, #tpu.memory_space<vmem>>, %arg8: memref<1x1xf32, #tpu.memory_space<vmem>>) attributes {dimension_semantics = [#tpu.dimension_semantics<arbitrary>], iteration_bounds = array<i64: 1>, scalar_prefetch = 0 : i64, scratch_operands = 2 : i64, tpu.core_type = #tpu.core_type<tc>, window_params = [{transform_indices = @transform_0, window_bounds = array<i64: 8, 128>}, {transform_indices = @transform_1, window_bounds = array<i64: 8, 128>}, {transform_indices = @transform_2, window_bounds = array<i64: 8, 128>}, {transform_indices = @transform_3, window_bounds = array<i64: 1, 2>}, {pipeline_mode = #tpu.pipeline_mode<synchronous>, transform_indices = @transform_4, window_bounds = array<i64: 2, 64, 64>}, {pipeline_mode = #tpu.pipeline_mode<synchronous>, transform_indices = @transform_5, window_bounds = array<i64: 1, 1>}]} {
    %c0_i32 = arith.constant 0 : i32
    %0 = arith.cmpi eq, %arg0, %c0_i32 : i32
    %1 = arith.extui %0 : i1 to i32
    %c0_i32_0 = arith.constant 0 : i32
    %2 = arith.cmpi ne, %1, %c0_i32_0 : i32
    scf.if %2 {
      %cst_21 = arith.constant 0.000000e+00 : f32
      %39 = vector.broadcast %cst_21 : f32 to vector<1x1xf32>
      %c0_22 = arith.constant 0 : index
      %c0_23 = arith.constant 0 : index
      %40 = vector.load %arg7[%c0_22, %c0_23] : memref<1x1xf32, #tpu.memory_space<vmem>>, vector<1x1xf32>
      tpu.vector_store %arg7[%c0_22, %c0_23], %39 {strides = array<i32>} : memref<1x1xf32, #tpu.memory_space<vmem>>, vector<1x1xf32>,
      %cst_24 = arith.constant 0.000000e+00 : f32
      %41 = vector.broadcast %cst_24 : f32 to vector<1x1xf32>
      %c0_25 = arith.constant 0 : index
      %c0_26 = arith.constant 0 : index
      %42 = vector.load %arg8[%c0_25, %c0_26] : memref<1x1xf32, #tpu.memory_space<vmem>>, vector<1x1xf32>
      tpu.vector_store %arg8[%c0_25, %c0_26], %41 {strides = array<i32>} : memref<1x1xf32, #tpu.memory_space<vmem>>, vector<1x1xf32>,
    } else {
    }
    %c0 = arith.constant 0 : index
    %c0_1 = arith.constant 0 : index
    %3 = memref.load %arg4[%c0, %c0_1] : memref<1x2xf32, #tpu.memory_space<smem>>
    %c0_2 = arith.constant 0 : index
    %c1 = arith.constant 1 : index
    %4 = memref.load %arg4[%c0_2, %c1] : memref<1x2xf32, #tpu.memory_space<smem>>
    %c0_3 = arith.constant 0 : index
    %c0_4 = arith.constant 0 : index
    %5 = vector.load %arg3[%c0_3, %c0_4] : memref<8x128xi32, #tpu.memory_space<vmem>>, vector<8x128xi32>
    %c0_5 = arith.constant 0 : index
    %c0_6 = arith.constant 0 : index
    %6 = vector.load %arg1[%c0_5, %c0_6] : memref<8x128xf32, #tpu.memory_space<vmem>>, vector<8x128xf32>
    %c0_7 = arith.constant 0 : index
    %c0_8 = arith.constant 0 : index
    %7 = vector.load %arg2[%c0_7, %c0_8] : memref<8x128xf32, #tpu.memory_space<vmem>>, vector<8x128xf32>
    %c1_i32 = arith.constant 1 : i32
    %8 = vector.broadcast %c1_i32 : i32 to vector<8x128xi32>
    %9 = arith.cmpi eq, %5, %8 : vector<8x128xi32>
    %c0_i32_9 = arith.constant 0 : i32
    %10 = vector.broadcast %c0_i32_9 : i32 to vector<8x128xi32>
    %11 = arith.cmpi sge, %5, %10 : vector<8x128xi32>
    %12 = arith.extui %11 : vector<8x128xi1> to vector<8x128xi32>
    %13 = arith.sitofp %12 : vector<8x128xi32> to vector<8x128xf32>
    %14 = arith.select %9, %7, %6 : vector<8x128xi1>, vector<8x128xf32>
    %15 = vector.broadcast %4 : f32 to vector<8x128xf32>
    %16 = vector.broadcast %3 : f32 to vector<8x128xf32>
    %17 = arith.select %9, %15, %16 : vector<8x128xi1>, vector<8x128xf32>
    %18 = arith.mulf %17, %13 : vector<8x128xf32>
    %c0_10 = arith.constant 0 : index
    %c0_11 = arith.constant 0 : index
    %19 = vector.load %arg7[%c0_10, %c0_11] : memref<1x1xf32, #tpu.memory_space<vmem>>, vector<1x1xf32>
    %20 = arith.mulf %18, %14 : vector<8x128xf32>
    %21 = vector.shape_cast %20 : vector<8x128xf32> to vector<1x8x128xf32>
    %cst = arith.constant dense<0.000000e+00> : vector<1xf32>
    %22 = vector.multi_reduction <add>, %21, %cst [1, 2] : vector<1x8x128xf32> to vector<1xf32>
    %23 = vector.shape_cast %22 : vector<1xf32> to vector<1x1x1xf32>
    %24 = vector.extract %23[0, 0, 0] : f32 from vector<1x1x1xf32>
    %25 = vector.broadcast %24 : f32 to vector<1x1xf32>
    %26 = arith.addf %19, %25 : vector<1x1xf32>
    %c0_12 = arith.constant 0 : index
    %c0_13 = arith.constant 0 : index
    %27 = vector.load %arg7[%c0_12, %c0_13] : memref<1x1xf32, #tpu.memory_space<vmem>>, vector<1x1xf32>
    tpu.vector_store %arg7[%c0_12, %c0_13], %26 {strides = array<i32>} : memref<1x1xf32, #tpu.memory_space<vmem>>, vector<1x1xf32>,
    %c0_14 = arith.constant 0 : index
    %c0_15 = arith.constant 0 : index
    %28 = vector.load %arg8[%c0_14, %c0_15] : memref<1x1xf32, #tpu.memory_space<vmem>>, vector<1x1xf32>
    %29 = vector.shape_cast %18 : vector<8x128xf32> to vector<1x8x128xf32>
    %cst_16 = arith.constant dense<0.000000e+00> : vector<1xf32>
    %30 = vector.multi_reduction <add>, %29, %cst_16 [1, 2] : vector<1x8x128xf32> to vector<1xf32>
    %31 = vector.shape_cast %30 : vector<1xf32> to vector<1x1x1xf32>
    %32 = vector.extract %31[0, 0, 0] : f32 from vector<1x1x1xf32>
    %33 = vector.broadcast %32 : f32 to vector<1x1xf32>
    %34 = arith.addf %28, %33 : vector<1x1xf32>
    %c0_17 = arith.constant 0 : index
    %c0_18 = arith.constant 0 : index
    %35 = vector.load %arg8[%c0_17, %c0_18] : memref<1x1xf32, #tpu.memory_space<vmem>>, vector<1x1xf32>
    tpu.vector_store %arg8[%c0_17, %c0_18], %34 {strides = array<i32>} : memref<1x1xf32, #tpu.memory_space<vmem>>, vector<1x1xf32>,
    %c0_i32_19 = arith.constant 0 : i32
    %36 = arith.cmpi eq, %arg0, %c0_i32_19 : i32
    %37 = arith.extui %36 : i1 to i32
    %c0_i32_20 = arith.constant 0 : i32
    %38 = arith.cmpi ne, %37, %c0_i32_20 : i32
    scf.if %38 {
      %c0_21 = arith.constant 0 : index
      %c0_22 = arith.constant 0 : index
      %c0_23 = arith.constant 0 : index
      %39 = vector.load %arg5[%c0_21, %c0_22, %c0_23] : memref<2x64x64xf32, #tpu.memory_space<vmem>>, vector<2x64x64xf32>
      "tpu.trace_start"() <{level = 10 : i32, message = "bij,bkj->bik"}> : () -> ()
      %cst_24 = arith.constant dense<0.000000e+00> : vector<2x64x64xf32>
      %40 = tpu.matmul %39, %39, %cst_24 {dimension_numbers = #tpu.dot_dimension_numbers<[2], [2], [1], [1], [0, 0, 0, 1, 1, 1], [0], [0]>} : vector<2x64x64xf32>, vector<2x64x64xf32>, vector<2x64x64xf32> -> vector<2x64x64xf32>
      "tpu.trace_stop"() : () -> ()
      %41 = arith.mulf %40, %40 : vector<2x64x64xf32>
      %cst_25 = arith.constant dense<0.000000e+00> : vector<2x64xf32>
      %42 = vector.multi_reduction <add>, %41, %cst_25 [2] : vector<2x64x64xf32> to vector<2x64xf32>
      %43 = vector.shape_cast %42 : vector<2x64xf32> to vector<2x64x1xf32>
      %cst_26 = arith.constant dense<0.000000e+00> : vector<2x1xf32>
      %44 = vector.multi_reduction <add>, %43, %cst_26 [1] : vector<2x64x1xf32> to vector<2x1xf32>
      %45 = vector.shape_cast %44 : vector<2x1xf32> to vector<2x1x1xf32>
      %46 = arith.mulf %39, %39 : vector<2x64x64xf32>
      %cst_27 = arith.constant dense<0.000000e+00> : vector<2x64xf32>
      %47 = vector.multi_reduction <add>, %46, %cst_27 [2] : vector<2x64x64xf32> to vector<2x64xf32>
      %48 = vector.shape_cast %47 : vector<2x64xf32> to vector<2x64x1xf32>
      %cst_28 = arith.constant dense<0.000000e+00> : vector<2x1xf32>
      %49 = vector.multi_reduction <add>, %48, %cst_28 [1] : vector<2x64x1xf32> to vector<2x1xf32>
      %50 = vector.shape_cast %49 : vector<2x1xf32> to vector<2x1x1xf32>
      %cst_29 = arith.constant 2.000000e+00 : f32
      %51 = vector.broadcast %cst_29 : f32 to vector<2x1x1xf32>
      %52 = arith.mulf %51, %50 : vector<2x1x1xf32>
      %53 = arith.subf %45, %52 : vector<2x1x1xf32>
      %cst_30 = arith.constant 6.400000e+01 : f32
      %54 = vector.broadcast %cst_30 : f32 to vector<2x1x1xf32>
      %55 = arith.addf %53, %54 : vector<2x1x1xf32>
      %cst_31 = arith.constant 0.000000e+00 : f32
      %56 = vector.broadcast %cst_31 : f32 to vector<2x1x1xf32>
      %57 = arith.maximumf %55, %56 : vector<2x1x1xf32>
      %58 = math.sqrt %57 : vector<2x1x1xf32>
      %59 = vector.shape_cast %58 : vector<2x1x1xf32> to vector<1x2x1x1xf32>
      %cst_32 = arith.constant dense<0.000000e+00> : vector<1xf32>
      %60 = vector.multi_reduction <add>, %59, %cst_32 [1, 2, 3] : vector<1x2x1x1xf32> to vector<1xf32>
      %61 = vector.shape_cast %60 : vector<1xf32> to vector<1x1x1x1xf32>
      %62 = vector.extract %61[0, 0, 0, 0] : f32 from vector<1x1x1x1xf32>
      %cst_33 = arith.constant 2.000000e+00 : f32
      %63 = arith.divf %62, %cst_33 : f32
      %c0_34 = arith.constant 0 : index
      %c0_35 = arith.constant 0 : index
      %64 = vector.load %arg7[%c0_34, %c0_35] : memref<1x1xf32, #tpu.memory_space<vmem>>, vector<1x1xf32>
      %cst_36 = arith.constant 0.000000e+00 : f32
      %65 = vector.broadcast %cst_36 : f32 to vector<1x1xf32>
      %66 = arith.subf %65, %64 : vector<1x1xf32>
      %c0_37 = arith.constant 0 : index
      %c0_38 = arith.constant 0 : index
      %67 = vector.load %arg8[%c0_37, %c0_38] : memref<1x1xf32, #tpu.memory_space<vmem>>, vector<1x1xf32>
      %68 = arith.divf %66, %67 : vector<1x1xf32>
      %cst_39 = arith.constant 1.000000e-03 : f32
      %69 = arith.mulf %63, %cst_39 : f32
      %70 = vector.broadcast %69 : f32 to vector<1x1xf32>
      %71 = arith.addf %68, %70 : vector<1x1xf32>
      %c0_40 = arith.constant 0 : index
      %c0_41 = arith.constant 0 : index
      %72 = vector.load %arg6[%c0_40, %c0_41] : memref<1x1xf32, #tpu.memory_space<vmem>>, vector<1x1xf32>
      tpu.vector_store %arg6[%c0_40, %c0_41], %71 {strides = array<i32>} : memref<1x1xf32, #tpu.memory_space<vmem>>, vector<1x1xf32>,
    } else {
    }
    return
  }
  func.func @transform_0(%arg0: i32) -> (i32, i32) {
    %c0_i32 = arith.constant 0 : i32
    %c0_i32_0 = arith.constant 0 : i32
    return %arg0, %c0_i32 : i32, i32
  }
  func.func @transform_1(%arg0: i32) -> (i32, i32) {
    %c0_i32 = arith.constant 0 : i32
    %c0_i32_0 = arith.constant 0 : i32
    return %arg0, %c0_i32 : i32, i32
  }
  func.func @transform_2(%arg0: i32) -> (i32, i32) {
    %c0_i32 = arith.constant 0 : i32
    %c0_i32_0 = arith.constant 0 : i32
    return %arg0, %c0_i32 : i32, i32
  }
  func.func @transform_3(%arg0: i32) -> (i32, i32) {
    %c0_i32 = arith.constant 0 : i32
    %c0_i32_0 = arith.constant 0 : i32
    %c0_i32_1 = arith.constant 0 : i32
    return %c0_i32, %c0_i32_0 : i32, i32
  }
  func.func @transform_4(%arg0: i32) -> (i32, i32, i32) {
    %c0_i32 = arith.constant 0 : i32
    %c0_i32_0 = arith.constant 0 : i32
    %c0_i32_1 = arith.constant 0 : i32
    %c0_i32_2 = arith.constant 0 : i32
    return %c0_i32, %c0_i32_0, %c0_i32_1 : i32, i32, i32
  }
  func.func @transform_5(%arg0: i32) -> (i32, i32) {
    %c0_i32 = arith.constant 0 : i32
    %c0_i32_0 = arith.constant 0 : i32
    %c0_i32_1 = arith.constant 0 : i32
    return %c0_i32, %c0_i32_0 : i32, i32
  }
}

</mosaic_0001>

<bundles_post_ra>
// kernel: tpu_custom_call.1
= control target key start
LH: loop header
LB: loop body
LE: loop exit
PB: predicated region body
PF: predicated region fallthrough
CT: control target
= control target key end

     0   :  { %10 = vsyncpa [#allocation5], 0  ;;  %s1232_s0 = inlined_call_operand.hbm [shape: f32[8,128], index: 0, kind: input, shape index: {}]   ;;  %s1233_s1 = inlined_call_operand.hbm [shape: f32[8,128], index: 1, kind: input, shape index: {}]   ;;  %s1234_s2 = inlined_call_operand.hbm [shape: s32[8,128], index: 2, kind: input, shape index: {}]   ;;  %s1235_s3 = inlined_call_operand.vmem [shape: f32[1,2], index: 3, kind: input, shape index: {}]   ;;  %s1236_s4 = inlined_call_operand.hbm [shape: f32[2,64,64], index: 4, kind: input, shape index: {}]   ;;  %s1237_s5 = inlined_call_operand.hbm [shape: f32[1,1], index: 5, kind: output, shape index: {}]  }
   0x1   :  { %11 = vsyncpa [#allocation9], 0 }
   0x2   :  { %12 = vsyncpa [#allocation7], 0 }
   0x3   :  { %13 = vsyncpa [#allocation13], 0 }
   0x4   :  { %14 = vsyncpa [#allocation6], 0  ;;  %s977_s18 = smov [#allocation8]   ;;  %s978_s20 = smov [#allocation4]  }
   0x5   :  { %s31_s19 = sshll.u32 %s977_s18, 4  ;;  %s21_s21 = sshll.u32 %s978_s20, 4  ;;  %s32_s19 = int_to_ptr.vmem [resolvable:$true] %s31_s19  ;;  %s22_s21 = int_to_ptr.vmem [resolvable:$true] %s21_s21 }
   0x6   :  { %s845_s24 = scalar_lea.hbm %s1233_s1, 128 }
   0x7   :  { %p846_p0 = scmp.ne.s32.totalorder %s1233_s1, %s845_s24  ;;  %p849_p1 = scmp.lt.u32.totalorder %s845_s24, %s1233_s1 }
   0x9   :  { %p851_p2 = pnand %p849_p1, %p846_p0 }
   0xb   :  { %854 = shalt.err (!%p851_p2)
}
   0xc   :  { %s855_s29 = scalar_lea.vmem %s32_s19, 128  ;;  %p860_p4 = scmp.lt.s32.totalorder %s32_s19, %s32_s19 }
   0xd   :  { %p856_p3 = scmp.ne.s32.totalorder %s32_s19, %s855_s29  ;;  %p861_p5 = scmp.lt.s32.totalorder %s855_s29, %s855_s29 }
   0xf   :  { %p862_p6 = por %p861_p5, %p860_p4 }
  0x11   :  { %p863_p7 = pnand %p862_p6, %p856_p3 }
  0x13   :  { %866 = shalt.err (!%p863_p7)
}
  0x14   :  { %34 = dma.hbm_to_vmem [thread:$0]  %s1233_s1, 128, %s32_s19, [#allocation9]  }
  0x15   :  { %s867_s9 = scalar_lea.hbm %s1232_s0, 128 }
  0x16   :  { %p868_p8 = scmp.ne.s32.totalorder %s1232_s0, %s867_s9  ;;  %p871_p9 = scmp.lt.u32.totalorder %s867_s9, %s1232_s0 }
  0x18   :  { %p873_p10 = pnand %p871_p9, %p868_p8 }
  0x1a   :  { %876 = shalt.err (!%p873_p10)
}
  0x1b   :  { %s877_s14 = scalar_lea.vmem %s22_s21, 128  ;;  %p882_p12 = scmp.lt.s32.totalorder %s22_s21, %s22_s21 }
  0x1c   :  { %p878_p11 = scmp.ne.s32.totalorder %s22_s21, %s877_s14  ;;  %p883_p13 = scmp.lt.s32.totalorder %s877_s14, %s877_s14 }
  0x1e   :  { %p884_p0 = por %p883_p13, %p882_p12 }
  0x20   :  { %p885_p1 = pnand %p884_p0, %p878_p11 }
  0x22   :  { %888 = shalt.err (!%p885_p1)
}
  0x23   :  { %24 = dma.hbm_to_vmem [thread:$0]  %s1232_s0, 128, %s22_s21, [#allocation5]  }
  0x24   :  { %s51_s18 = sshll.u32 %s1235_s3, 4  ;;  %s979_s19 = smov [#allocation10]   ;;  %s52_s18 = int_to_ptr.vmem [resolvable:$true] %s51_s18 }
  0x25   :  { %s41_s20 = sshll.u32 %s979_s19, 4  ;;  %s889_s24 = scalar_lea.hbm %s1234_s2, 128  ;;  %s42_s20 = int_to_ptr.vmem [resolvable:$true] %s41_s20 }
  0x26   :  { %p890_p2 = scmp.ne.s32.totalorder %s1234_s2, %s889_s24  ;;  %p893_p3 = scmp.lt.u32.totalorder %s889_s24, %s1234_s2 }
  0x28   :  { %p895_p4 = pnand %p893_p3, %p890_p2 }
  0x2a   :  { %898 = shalt.err (!%p895_p4)
}
  0x2b   :  { %s899_s0 = scalar_lea.vmem %s42_s20, 128  ;;  %p904_p6 = scmp.lt.s32.totalorder %s42_s20, %s42_s20 }
  0x2c   :  { %p900_p5 = scmp.ne.s32.totalorder %s42_s20, %s899_s0  ;;  %p905_p7 = scmp.lt.s32.totalorder %s899_s0, %s899_s0 }
  0x2e   :  { %p906_p8 = por %p905_p7, %p904_p6 }
  0x30   :  { %p907_p9 = pnand %p906_p8, %p900_p5 }
  0x32   :  { %910 = shalt.err (!%p907_p9)
}
  0x33   :  { %44 = dma.hbm_to_vmem [thread:$0]  %s1234_s2, 128, %s42_s20, [#allocation9]  }
  0x34   :  { %s911_s29 = scalar_lea.vmem %s52_s18, 16  ;;  %p916_p11 = scmp.lt.s32.totalorder %s52_s18, %s52_s18 }
  0x35   :  { %p912_p10 = scmp.ne.s32.totalorder %s52_s18, %s911_s29  ;;  %p917_p12 = scmp.lt.s32.totalorder %s911_s29, %s911_s29 }
  0x37   :  { %p918_p13 = por %p917_p12, %p916_p11 }
  0x39   :  { %p919_p0 = pnand %p918_p13, %p912_p10 }
  0x3b   :  { %922 = shalt.err (!%p919_p0)
}
  0x3c   :  { %s980_s30 = smov [#allocation11]   ;;  %s981_s6 = smov [#allocation12]  }
  0x3d   :  { %54 = dma.vmem_to_smem %s52_s18, 16, %s980_s30, [#allocation7]  }
  0x3e   :  { %s60_s7 = sshll.u32 %s981_s6, 4  ;;  %s923_s10 = scalar_lea.hbm %s1236_s4, 2048  ;;  %s61_s7 = int_to_ptr.vmem [resolvable:$true] %s60_s7 }
  0x3f   :  { %p924_p1 = scmp.ne.s32.totalorder %s1236_s4, %s923_s10  ;;  %p927_p2 = scmp.lt.u32.totalorder %s923_s10, %s1236_s4 }
  0x41   :  { %p929_p3 = pnand %p927_p2, %p924_p1 }
  0x43   :  { %932 = shalt.err (!%p929_p3)
}
  0x44   :  { %s933_s14 = scalar_lea.vmem %s61_s7, 2048  ;;  %p938_p5 = scmp.lt.s32.totalorder %s61_s7, %s61_s7 }
  0x45   :  { %p934_p4 = scmp.ne.s32.totalorder %s61_s7, %s933_s14  ;;  %p939_p6 = scmp.lt.s32.totalorder %s933_s14, %s933_s14 }
  0x47   :  { %p940_p7 = por %p939_p6, %p938_p5 }
  0x49   :  { %p941_p8 = pnand %p940_p7, %p934_p4 }
  0x4b   :  { %944 = shalt.err (!%p941_p8)
}
  0x4c   :  { %s982_s1 = smov 128   ;;  %s983_s15 = smov 8  }
  0x4d   :  { %66 = dma.hbm_to_vmem [thread:$0]  %s1236_s4, 2048, %s61_s7, [#allocation13], %s982_s1, %s982_s1, %s983_s15  }
  0x4e   :  { %967 = dma.done.wait [#allocation5], 128  }
  0x4f   :  { %968 = vsyncadd [#allocation5], 4294967168 }
  0x50   :  { %969 = dma.done.wait [#allocation9], 256  }
  0x51   :  { %970 = vsyncadd [#allocation9], 4294967040 }
  0x52   :  { %971 = dma.done.wait [#allocation7], 16  }
  0x53   :  { %972 = vsyncadd [#allocation7], 4294967280 }
  0x54   :  { %973 = dma.done.wait [#allocation13], 2048  }
  0x55   :  { %974 = vsyncadd [#allocation13], 4294965248 }
  0x56   :  { %82 = sfence }
  0x57   :  { %v135_v0 = vld [vmem:[#allocation12] sm:$0xff]  ;;  %v1067_v1 = vld [vmem:[#allocation12 + $0x8] sm:$0xff]  ;;  %vm151_vm0 = vcmask 523264   ;;  %v1078_v6 = vld [vmem:[#allocation12 + $0x10] sm:$0xff]  ;;  %s90_s4 = sld [smem:[#allocation11]]  ;;  %s654_s18 = sld [smem:[#allocation11 + $0x1]] }
  0x58   :  { %v143_v2 = vld [vmem:[#allocation12 + $0x40] sm:$0xff]  ;;  %v776_v3 = vpack.c.bf16 %v1067_v1, %v135_v0  ;;  %vm1072_vm1 = vmpackc.low %vm151_vm0, %vm151_vm0  ;;  %v1076_v5 = vld [vmem:[#allocation12 + $0x48] sm:$0xff]  ;;  %736 = vmatprep.mubr.msk.f32.mxu0 %vm151_vm0, %v135_v0  ;;  %v500_v8 = vmul.f32 %v135_v0, %v135_v0  ;;  %v501_v18 = vmul.f32 %v1067_v1, %v1067_v1  ;;  %v502_v26 = vmul.f32 %v1078_v6, %v1078_v6  ;;  %s985_s25 = smov [#allocation14]  }
  0x59   :  { %764 = vmatprep.mubr.msk.f32.mxu1 %vm151_vm0, %v143_v2  ;;  %v508_v7 = vmul.f32 %v143_v2, %v143_v2  ;;  %v800_v9 = vpack.c.bf16 %v1076_v5, %v143_v2  ;;  %v1083_v10 = vld [vmem:[#allocation12 + $0x18] sm:$0xff]  ;;  %v1085_v11 = vld [vmem:[#allocation12 + $0x50] sm:$0xff]  ;;  %v509_v16 = vmul.f32 %v1076_v5, %v1076_v5  ;;  %v1111_v19 = vld [vmem:[#allocation12 + $0x20] sm:$0xff]  ;;  %vm87_vm4 = vcmask 0   ;;  %s642_s26 = sshll.u32 %s985_s25, 4  ;;  %s643_s26 = int_to_ptr.vmem [resolvable:$true] %s642_s26 }
  0x5a   :  { %v1087_v12 = vld [vmem:[#allocation12 + $0x58] sm:$0xff]  ;;  %778 = vmatprep.subr.msk.bf16.mxu0 %vm1072_vm1, %v776_v3  ;;  %v782_v13 = vpack.c.bf16 %v1083_v10, %v1078_v6  ;;  %v516_v17 = vsel %vm151_vm0, %v500_v8, 0.0  ;;  %v1113_v20 = vld [vmem:[#allocation12 + $0x28] sm:$0xff]  ;;  %v1115_v21 = vld [vmem:[#allocation12 + $0x60] sm:$0xff]  ;;  %v510_v24 = vmul.f32 %v1085_v11, %v1085_v11  ;;  %v519_v25 = vsel %vm151_vm0, %v501_v18, 0.0  ;;  %s945_s27 = scalar_lea.vmem %s643_s26, 16  ;;  %p950_p10 = scmp.lt.s32.totalorder %s643_s26, %s643_s26 }
  0x5b   :  { %v806_v14 = vpack.c.bf16 %v1087_v12, %v1085_v11  ;;  %v540_v15 = vsel %vm151_vm0, %v508_v7, 0.0  ;;  %781 = vmatpush3.bf16.xpose.msk.msra.mxu0 %vm1072_vm1, %v776_v3  ;;  %802 = vmatprep.subr.msk.bf16.mxu1 %vm1072_vm1, %v800_v9  ;;  %v1117_v22 = vld [vmem:[#allocation12 + $0x68] sm:$0xff]  ;;  %v543_v23 = vsel %vm151_vm0, %v509_v16, 0.0  ;;  %v788_v27 = vpack.c.bf16 %v1113_v20, %v1111_v19  ;;  %v141_v33 = vld [vmem:[#allocation12 + $0x30] sm:$0xff]  ;;  %v142_v34 = vld [vmem:[#allocation12 + $0x38] sm:$0xff]  ;;  %p946_p9 = scmp.ne.s32.totalorder %s643_s26, %s945_s27  ;;  %s949_s28 = scalar_lea.vmem %s643_s26, 32 }
  0x5c   :  { %805 = vmatpush3.bf16.xpose.msk.msra.mxu1 %vm1072_vm1, %v800_v9  ;;  %784 = vmatprep.subr.msk.bf16.mxu0 %vm1072_vm1, %v782_v13  ;;  %v812_v28 = vpack.c.bf16 %v1117_v22, %v1115_v21  ;;  %v546_v29 = vsel %vm151_vm0, %v510_v24, 0.0  ;;  %v511_v30 = vmul.f32 %v1087_v12, %v1087_v12  ;;  %v522_v31 = vsel %vm151_vm0, %v502_v26, 0.0  ;;  %v149_v35 = vld [vmem:[#allocation12 + $0x70] sm:$0xff]  ;;  %v150_v36 = vld [vmem:[#allocation12 + $0x78] sm:$0xff]  ;;  %p951_p11 = scmp.lt.s32.totalorder %s949_s28, %s945_s27 }
  0x5d   :  { %808 = vmatprep.subr.msk.bf16.mxu1 %vm1072_vm1, %v806_v14  ;;  %541 = vadd.xlane.f32.xlu1 %v540_v15  ;;  %v503_v32 = vmul.f32 %v1083_v10, %v1083_v10  ;;  %v512_v38 = vmul.f32 %v1115_v21, %v1115_v21  ;;  %v504_v40 = vmul.f32 %v1111_v19, %v1111_v19 }
  0x5e   :  { %517 = vadd.xlane.f32.xlu0 %v516_v17  ;;  %v549_v37 = vsel %vm151_vm0, %v511_v30, 0.0  ;;  %v794_v41 = vpack.c.bf16 %v142_v34, %v141_v33  ;;  %v818_v42 = vpack.c.bf16 %v150_v36, %v149_v35  ;;  %v513_v44 = vmul.f32 %v1117_v22, %v1117_v22  ;;  %p952_p12 = por %p951_p11, %p950_p10 }
  0x5f   :  { %v525_v39 = vsel %vm151_vm0, %v503_v32, 0.0  ;;  %v552_v43 = vsel %vm151_vm0, %v512_v38, 0.0  ;;  %v528_v45 = vsel %vm151_vm0, %v504_v40, 0.0  ;;  %v505_v46 = vmul.f32 %v1113_v20, %v1113_v20 }
  0x60   :  { %v555_v47 = vsel %vm151_vm0, %v513_v44, 0.0  ;;  %v514_v48 = vmul.f32 %v149_v35, %v149_v35  ;;  %v506_v50 = vmul.f32 %v141_v33, %v141_v33  ;;  %v515_v52 = vmul.f32 %v150_v36, %v150_v36  ;;  %p953_p13 = pnand %p952_p12, %p946_p9 }
  0x61   :  { %544 = vadd.xlane.f32.xlu1 %v543_v23  ;;  %v531_v49 = vsel %vm151_vm0, %v505_v46, 0.0  ;;  %v507_v54 = vmul.f32 %v142_v34, %v142_v34 }
  0x62   :  { %520 = vadd.xlane.f32.xlu0 %v519_v25  ;;  %v558_v51 = vsel %vm151_vm0, %v514_v48, 0.0  ;;  %v534_v53 = vsel %vm151_vm0, %v506_v50, 0.0  ;;  %v561_v55 = vsel %vm151_vm0, %v515_v52, 0.0  ;;  %v94_v48 = vld [vmem:[#allocation8] sm:$0xff] }
  0x63   :  { %787 = vmatpush3.bf16.xpose.msk.msra.mxu0 %vm1072_vm1, %v782_v13  ;;  %v537_v56 = vsel %vm151_vm0, %v507_v54, 0.0 }
  0x64   :  { %811 = vmatpush3.bf16.xpose.msk.msra.mxu1 %vm1072_vm1, %v806_v14  ;;  %790 = vmatprep.subr.msk.bf16.mxu0 %vm1072_vm1, %v788_v27 }
  0x65   :  { %814 = vmatprep.subr.msk.bf16.mxu1 %vm1072_vm1, %v812_v28  ;;  %547 = vadd.xlane.f32.xlu1 %v546_v29 }
  0x66   :  { %523 = vadd.xlane.f32.xlu0 %v522_v31 }
  0x69   :  { %550 = vadd.xlane.f32.xlu1 %v549_v37 }
  0x6a   :  { %526 = vadd.xlane.f32.xlu0 %v525_v39 }
  0x6b   :  { %793 = vmatpush3.bf16.xpose.msk.msra.mxu0 %vm1072_vm1, %v788_v27 }
  0x6c   :  { %817 = vmatpush3.bf16.xpose.msk.msra.mxu1 %vm1072_vm1, %v812_v28  ;;  %796 = vmatprep.subr.msk.bf16.mxu0 %vm1072_vm1, %v794_v41 }
  0x6d   :  { %820 = vmatprep.subr.msk.bf16.mxu1 %vm1072_vm1, %v818_v42  ;;  %553 = vadd.xlane.f32.xlu1 %v552_v43  ;;  %v984_v43 = vmov 0.0  }
  0x6e   :  { %529 = vadd.xlane.f32.xlu0 %v528_v45  ;;  %v101_v45 = vstv %s90_s4  ;;  %88 = vst.msk [vmem:[#allocation2] sm:$0x1] %vm87_vm4, %v984_v43  ;;  %89 = vst.msk [vmem:[#allocation3] sm:$0x1] %vm87_vm4, %v984_v43 }
  0x71   :  { %556 = vadd.xlane.f32.xlu1 %v555_v47  ;;  %v93_v47 = vld [vmem:[#allocation4] sm:$0xff] }
  0x72   :  { %532 = vadd.xlane.f32.xlu0 %v531_v49 }
  0x73   :  { %799 = vmatpush3.bf16.xpose.msk.msra.mxu0 %vm1072_vm1, %v794_v41  ;;  %v92_v41 = vld [vmem:[#allocation10] sm:$0xff] }
  0x74   :  { %823 = vmatpush3.bf16.xpose.msk.msra.mxu1 %vm1072_vm1, %v818_v42  ;;  %vm95_vm2 = vcmp.eq.s32.totalorder %v92_v41, 1  ;;  %vm96_vm3 = vcmp.ge.s32.totalorder %v92_v41, 0  ;;  %v100_v42 = vstv %s654_s18 }
  0x75   :  { %559 = vadd.xlane.f32.xlu1 %v558_v51  ;;  %v655_v44 = vsel %vm96_vm3, 1.0, %v984_v43  ;;  %v102_v46 = vsel %vm95_vm2, %v100_v42, %v101_v45  ;;  %v99_v50 = vsel %vm95_vm2, %v94_v48, %v93_v47 }
  0x76   :  { %535 = vadd.xlane.f32.xlu0 %v534_v53  ;;  %v103_v49 = vmul.f32 %v655_v44, %v102_v46 }
  0x78   :  { %v105_v51 = vmul.f32 %v103_v49, %v99_v50 }
  0x79   :  { %562 = vadd.xlane.f32.xlu1 %v561_v55 }
  0x7a   :  { %737 = vmatmul.mubr.msk.f32.vlgmr.msra.gmra.mrb[0].mxu0 %vm151_vm0, %v1067_v1  ;;  %538 = vadd.xlane.f32.xlu0 %v537_v56 }
  0x7b   :  { %765 = vmatmul.mubr.msk.f32.vlgmr.msra.gmra.mrb[0].mxu1 %vm151_vm0, %v1076_v5  ;;  %739 = vmatprep.mubr.msk.f32.mxu0 %vm151_vm0, %v1078_v6 }
  0x7c   :  { %767 = vmatprep.mubr.msk.f32.mxu1 %vm151_vm0, %v1085_v11 }
  0x7e   :  { %740 = vmatmul.mubr.msk.f32.gmra.mrb[2].mxu0 %vm151_vm0, %v1083_v10 }
  0x7f   :  { %768 = vmatmul.mubr.msk.f32.gmra.mrb[2].mxu1 %vm151_vm0, %v1087_v12  ;;  %742 = vmatprep.mubr.msk.f32.mxu0 %vm151_vm0, %v1111_v19 }
  0x80   :  { %770 = vmatprep.mubr.msk.f32.mxu1 %vm151_vm0, %v1115_v21 }
  0x82   :  { %743 = vmatmul.mubr.msk.f32.gmra.mrb[4].mxu0 %vm151_vm0, %v1113_v20 }
  0x83   :  { %771 = vmatmul.mubr.msk.f32.gmra.mrb[4].mxu1 %vm151_vm0, %v1117_v22  ;;  %745 = vmatprep.mubr.msk.f32.mxu0 %vm151_vm0, %v141_v33 }
  0x84   :  { %773 = vmatprep.mubr.msk.f32.mxu1 %vm151_vm0, %v149_v35 }
  0x86   :  { %746 = vmatmul.mubr.msk.f32.gmra.mrb[6].mxu0 %vm151_vm0, %v142_v34 }
  0x87   :  { %774 = vmatmul.mubr.msk.f32.gmra.mrb[6].mxu1 %vm151_vm0, %v150_v36 }
  0xea   :  { %v542_v52 = vpop.xlane.xlu1 %541 }
  0xeb   :  { %v518_v53 = vpop.xlane.xlu0 %517 }
  0xee   :  { %v545_v54 = vpop.xlane.xlu1 %544 }
  0xef   :  { %v521_v55 = vpop.xlane.xlu0 %520 }
  0xf2   :  { %v548_v56 = vpop.xlane.xlu1 %547 }
 0x14d   :  { %v738_v57 = vpop.f32.mrb[0].mxu0 }
 0x14e   :  { %v411_v58 = vmul.f32 %v738_v57, %v738_v57  ;;  %v242_v59 = vpop.f32.mrb[1].mxu0  ;;  %v766_v60 = vpop.f32.mrb[0].mxu1 }
 0x14f   :  { %v410_v61 = vmul.f32 %v242_v59, %v242_v59  ;;  %v419_v62 = vmul.f32 %v766_v60, %v766_v60  ;;  %v371_v63 = vpop.f32.mrb[1].mxu1  ;;  %v524_v57 = vpop.xlane.xlu0 %523 }
 0x150   :  { %v418_v0 = vmul.f32 %v371_v63, %v371_v63  ;;  %v429_v1 = vsel %vm151_vm0, %v411_v58, 0.0  ;;  %v551_v58 = vpop.xlane.xlu1 %550 }
 0x151   :  { %430 = vadd.xlane.f32.xlu1 %v429_v1  ;;  %v426_v2 = vsel %vm151_vm0, %v410_v61, 0.0  ;;  %v741_v3 = vpop.f32.mrb[2].mxu0  ;;  %v453_v5 = vsel %vm151_vm0, %v419_v62, 0.0  ;;  %v564_v1 = vadd.f32 %v521_v55, %v518_v53 }
 0x152   :  { %427 = vadd.xlane.f32.xlu0 %v426_v2  ;;  %v769_v4 = vpop.f32.mrb[2].mxu1  ;;  %v252_v6 = vpop.f32.mrb[3].mxu0  ;;  %v413_v8 = vmul.f32 %v741_v3, %v741_v3  ;;  %v450_v10 = vsel %vm151_vm0, %v418_v0, 0.0  ;;  %v577_v0 = vadd.f32 %v545_v54, %v542_v52 }
 0x153   :  { %v421_v7 = vmul.f32 %v769_v4, %v769_v4  ;;  %v381_v9 = vpop.f32.mrb[3].mxu1  ;;  %v412_v18 = vmul.f32 %v252_v6, %v252_v6  ;;  %v527_v59 = vpop.xlane.xlu0 %526 }
 0x154   :  { %v435_v15 = vsel %vm151_vm0, %v413_v8, 0.0  ;;  %v420_v17 = vmul.f32 %v381_v9, %v381_v9  ;;  %v554_v60 = vpop.xlane.xlu1 %553  ;;  %v578_v4 = vadd.f32 %v577_v0, %v548_v56 }
 0x155   :  { %454 = vadd.xlane.f32.xlu1 %v453_v5  ;;  %v744_v11 = vpop.f32.mrb[4].mxu0  ;;  %v459_v12 = vsel %vm151_vm0, %v421_v7, 0.0  ;;  %v432_v26 = vsel %vm151_vm0, %v412_v18, 0.0  ;;  %v565_v5 = vadd.f32 %v564_v1, %v524_v57 }
 0x156   :  { %451 = vadd.xlane.f32.xlu0 %v450_v10  ;;  %v772_v13 = vpop.f32.mrb[4].mxu1  ;;  %v262_v14 = vpop.f32.mrb[5].mxu0  ;;  %v415_v23 = vmul.f32 %v744_v11, %v744_v11  ;;  %v456_v25 = vsel %vm151_vm0, %v420_v17, 0.0  ;;  %v579_v7 = vadd.f32 %v578_v4, %v551_v58 }
 0x157   :  { %v391_v16 = vpop.f32.mrb[5].mxu1  ;;  %v423_v20 = vmul.f32 %v772_v13, %v772_v13  ;;  %v414_v30 = vmul.f32 %v262_v14, %v262_v14  ;;  %v530_v61 = vpop.xlane.xlu0 %529  ;;  %v566_v9 = vadd.f32 %v565_v5, %v527_v59 }
 0x158   :  { %v441_v28 = vsel %vm151_vm0, %v415_v23, 0.0  ;;  %v422_v29 = vmul.f32 %v391_v16, %v391_v16  ;;  %v557_v62 = vpop.xlane.xlu1 %556  ;;  %v580_v11 = vadd.f32 %v579_v7, %v554_v60 }
 0x159   :  { %460 = vadd.xlane.f32.xlu1 %v459_v12  ;;  %v747_v19 = vpop.f32.mrb[6].mxu0  ;;  %v465_v27 = vsel %vm151_vm0, %v423_v20, 0.0  ;;  %v438_v34 = vsel %vm151_vm0, %v414_v30, 0.0  ;;  %v567_v13 = vadd.f32 %v566_v9, %v530_v61 }
 0x15a   :  { %436 = vadd.xlane.f32.xlu0 %v435_v15  ;;  %v775_v21 = vpop.f32.mrb[6].mxu1  ;;  %v272_v22 = vpop.f32.mrb[7].mxu0  ;;  %v462_v33 = vsel %vm151_vm0, %v422_v29, 0.0  ;;  %v417_v38 = vmul.f32 %v747_v19, %v747_v19  ;;  %v581_v15 = vadd.f32 %v580_v11, %v557_v62 }
 0x15b   :  { %v401_v24 = vpop.f32.mrb[7].mxu1  ;;  %v416_v32 = vmul.f32 %v272_v22, %v272_v22  ;;  %v425_v37 = vmul.f32 %v775_v21, %v775_v21  ;;  %v533_v63 = vpop.xlane.xlu0 %532 }
 0x15c   :  { %v424_v31 = vmul.f32 %v401_v24, %v401_v24  ;;  %v447_v40 = vsel %vm151_vm0, %v417_v38, 0.0  ;;  %v560_v2 = vpop.xlane.xlu1 %559  ;;  %v568_v17 = vadd.f32 %v567_v13, %v533_v63 }
 0x15d   :  { %457 = vadd.xlane.f32.xlu1 %v456_v25  ;;  %v444_v36 = vsel %vm151_vm0, %v416_v32, 0.0  ;;  %v471_v39 = vsel %vm151_vm0, %v425_v37, 0.0  ;;  %v582_v19 = vadd.f32 %v581_v15, %v560_v2 }
 0x15e   :  { %433 = vadd.xlane.f32.xlu0 %v432_v26  ;;  %v468_v35 = vsel %vm151_vm0, %v424_v31, 0.0 }
 0x15f   :  { %v536_v3 = vpop.xlane.xlu0 %535 }
 0x160   :  { %v563_v6 = vpop.xlane.xlu1 %562  ;;  %v569_v21 = vadd.f32 %v568_v17, %v536_v3 }
 0x161   :  { %466 = vadd.xlane.f32.xlu1 %v465_v27  ;;  %v583_v23 = vadd.f32 %v582_v19, %v563_v6 }
 0x162   :  { %442 = vadd.xlane.f32.xlu0 %v441_v28 }
 0x163   :  { %v539_v8 = vpop.xlane.xlu0 %538  ;;  %v584_v31 = vrot.slane %v583_v23, 4 }
 0x164   :  { %v570_v26 = vadd.f32 %v569_v21, %v539_v8 }
 0x165   :  { %463 = vadd.xlane.f32.xlu1 %v462_v33  ;;  %v585_v37 = vadd.f32 %v584_v31, %v583_v23 }
 0x166   :  { %439 = vadd.xlane.f32.xlu0 %v438_v34  ;;  %v571_v33 = vrot.slane %v570_v26, 4 }
 0x167   :  { %v586_v45 = vrot.slane %v585_v37, 2 }
 0x169   :  { %469 = vadd.xlane.f32.xlu1 %v468_v35 }
 0x16a   :  { %445 = vadd.xlane.f32.xlu0 %v444_v36 }
 0x16d   :  { %472 = vadd.xlane.f32.xlu1 %v471_v39 }
 0x16e   :  { %448 = vadd.xlane.f32.xlu0 %v447_v40  ;;  %v572_v40 = vadd.f32 %v571_v33, %v570_v26 }
 0x170   :  { %v573_v47 = vrot.slane %v572_v40, 2 }
 0x171   :  { %120 = vadd.xlane.f32.xlu1 %v103_v49 }
 0x172   :  { %106 = vadd.xlane.f32.xlu0 %v105_v51  ;;  %v587_v51 = vadd.f32 %v586_v45, %v585_v37  ;;  %v574_v54 = vadd.f32 %v573_v47, %v572_v40 }
 0x174   :  { %v588_v58 = vrot.slane %v587_v51, 1  ;;  %v575_v60 = vrot.slane %v574_v54, 1 }
 0x176   :  { %v589_v0 = vadd.f32 %v588_v58, %v587_v51  ;;  %v576_v2 = vadd.f32 %v575_v60, %v574_v54 }
 0x178   :  { %v591_v6 = vmul.f32 2.0, %v589_v0  ;;  %v590_v8 = vmul.f32 2.0, %v576_v2 }
 0x1de   :  { %v431_v10 = vpop.xlane.xlu1 %430 }
 0x1df   :  { %v428_v12 = vpop.xlane.xlu0 %427 }
 0x1e0   :  { %v474_v27 = vadd.f32 %v431_v10, %v428_v12 }
 0x1e2   :  { %v455_v14 = vpop.xlane.xlu1 %454 }
 0x1e3   :  { %v452_v16 = vpop.xlane.xlu0 %451 }
 0x1e4   :  { %v487_v24 = vadd.f32 %v455_v14, %v452_v16 }
 0x1e6   :  { %v461_v18 = vpop.xlane.xlu1 %460 }
 0x1e7   :  { %v437_v20 = vpop.xlane.xlu0 %436 }
 0x1ea   :  { %v458_v22 = vpop.xlane.xlu1 %457 }
 0x1eb   :  { %v434_v25 = vpop.xlane.xlu0 %433  ;;  %v488_v28 = vadd.f32 %v487_v24, %v458_v22 }
 0x1ec   :  { %v475_v29 = vadd.f32 %v474_v27, %v434_v25 }
 0x1ed   :  { %v489_v34 = vadd.f32 %v488_v28, %v461_v18 }
 0x1ee   :  { %v467_v30 = vpop.xlane.xlu1 %466  ;;  %v476_v36 = vadd.f32 %v475_v29, %v437_v20 }
 0x1ef   :  { %v443_v32 = vpop.xlane.xlu0 %442 }
 0x1f2   :  { %v464_v35 = vpop.xlane.xlu1 %463 }
 0x1f3   :  { %v490_v38 = vadd.f32 %v489_v34, %v464_v35  ;;  %v440_v39 = vpop.xlane.xlu0 %439 }
 0x1f4   :  { %v477_v41 = vadd.f32 %v476_v36, %v440_v39 }
 0x1f5   :  { %v491_v42 = vadd.f32 %v490_v38, %v467_v30 }
 0x1f6   :  { %v470_v43 = vpop.xlane.xlu1 %469  ;;  %v478_v44 = vadd.f32 %v477_v41, %v443_v32 }
 0x1f7   :  { %v446_v46 = vpop.xlane.xlu0 %445  ;;  %v492_v48 = vadd.f32 %v491_v42, %v470_v43  ;;  %v104_v43 = vld [vmem:[#allocation2] sm:$0x1] }
 0x1f8   :  { %v479_v49 = vadd.f32 %v478_v44, %v446_v46  ;;  %v119_v44 = vld [vmem:[#allocation3] sm:$0x1] }
 0x1fa   :  { %v473_v50 = vpop.xlane.xlu1 %472 }
 0x1fb   :  { %v493_v52 = vadd.f32 %v492_v48, %v473_v50  ;;  %v449_v53 = vpop.xlane.xlu0 %448 }
 0x1fc   :  { %v480_v55 = vadd.f32 %v479_v49, %v449_v53 }
 0x1fd   :  { %v494_v56 = vrot.slane %v493_v52, 4 }
 0x1fe   :  { %v481_v57 = vrot.slane %v480_v55, 4  ;;  %v121_v14 = vpop.xlane.xlu1 %120 }
 0x1ff   :  { %v495_v59 = vadd.f32 %v494_v56, %v493_v52  ;;  %v122_v16 = vrot.slane %v121_v14, 4  ;;  %v107_v18 = vpop.xlane.xlu0 %106 }
 0x200   :  { %v482_v61 = vadd.f32 %v481_v57, %v480_v55  ;;  %v108_v20 = vrot.slane %v107_v18, 4 }
 0x201   :  { %v496_v62 = vrot.slane %v495_v59, 2  ;;  %v123_v19 = vadd.f32 %v122_v16, %v121_v14 }
 0x202   :  { %v483_v63 = vrot.slane %v482_v61, 2  ;;  %v109_v22 = vadd.f32 %v108_v20, %v107_v18 }
 0x203   :  { %v497_v1 = vadd.f32 %v496_v62, %v495_v59  ;;  %v124_v21 = vrot.slane %v123_v19, 2 }
 0x204   :  { %v484_v3 = vadd.f32 %v483_v63, %v482_v61  ;;  %v110_v24 = vrot.slane %v109_v22, 2 }
 0x205   :  { %v498_v4 = vrot.slane %v497_v1, 1  ;;  %v125_v23 = vadd.f32 %v124_v21, %v123_v19 }
 0x206   :  { %v485_v5 = vrot.slane %v484_v3, 1  ;;  %v111_v25 = vadd.f32 %v110_v24, %v109_v22 }
 0x207   :  { %v499_v7 = vadd.f32 %v498_v4, %v497_v1  ;;  %v126_v26 = vrot.slane %v125_v23, 1 }
 0x208   :  { %v486_v9 = vadd.f32 %v485_v5, %v484_v3  ;;  %v112_v28 = vrot.slane %v111_v25, 1 }
 0x209   :  { %v593_v10 = vsub.f32 %v499_v7, %v591_v6  ;;  %v127_v31 = vadd.f32 %v126_v26, %v125_v23 }
 0x20a   :  { %v592_v11 = vsub.f32 %v486_v9, %v590_v8  ;;  %v113_v34 = vadd.f32 %v112_v28, %v111_v25 }
 0x20b   :  { %v595_v12 = vadd.f32 64.0, %v593_v10 }
 0x20c   :  { %v594_v13 = vadd.f32 64.0, %v592_v11  ;;  %824 = vpush %v113_v34 }
 0x20d   :  { %v597_v15 = vmax.f32 %v595_v12, 0.0  ;;  %826 = vpush %v127_v31 }
 0x20e   :  { %v596_v17 = vmax.f32 %v594_v13, 0.0 }
 0x20f   :  { %839 = vrsqrt.f32 %v597_v15  ;;  %vm607_vm5 = vcmp.eq.f32.partialorder %v597_v15, inf  ;;  %v610_v33 = vand.u32 2147483648, %v597_v15  ;;  %vm609_vm7 = vcmp.eq.f32.partialorder %v597_v15, 0.0 }
 0x210   :  { %841 = vrsqrt.f32 %v596_v17  ;;  %vm600_vm6 = vcmp.eq.f32.partialorder %v596_v17, inf  ;;  %v603_v35 = vand.u32 2147483648, %v596_v17  ;;  %vm602_vm8 = vcmp.eq.f32.partialorder %v596_v17, 0.0 }
 0x219   :  { %v840_v27 = vpop.eup %839 }
 0x21a   :  { %v842_v29 = vpop.eup %841  ;;  %v606_v30 = vmul.f32 %v840_v27, %v597_v15 }
 0x21b   :  { %v599_v32 = vmul.f32 %v842_v29, %v596_v17 }
 0x21c   :  { %v608_v36 = vsel %vm607_vm5, %v597_v15, %v606_v30 }
 0x21d   :  { %v601_v37 = vsel %vm600_vm6, %v596_v17, %v599_v32  ;;  %v611_v38 = vsel %vm609_vm7, %v610_v33, %v608_v36 }
 0x21e   :  { %v604_v39 = vsel %vm602_vm8, %v603_v35, %v601_v37  ;;  %v613_v40 = vsel %vm87_vm4, %v611_v38, 0.0 }
 0x21f   :  { %v612_v41 = vsel %vm87_vm4, %v604_v39, 0.0 }
 0x220   :  { %v614_v42 = vadd.f32 %v613_v40, %v612_v41 }
 0x222   :  { %615 = vadd.xlane.f32.xlu0 %v614_v42 }
 0x23d   :  { %s825_s19 = spop %824 }
 0x23e   :  { %v115_v45 = vstv %s825_s19  ;;  %s827_s20 = spop %826 }
 0x23f   :  { %v116_v46 = vadd.f32 %v115_v45, %v104_v43  ;;  %v129_v47 = vstv %s827_s20 }
 0x240   :  { %v130_v48 = vadd.f32 %v129_v47, %v119_v44 }
 0x241   :  { %118 = vst.msk [vmem:[#allocation2] sm:$0x1] %vm87_vm4, %v116_v46 }
 0x242   :  { %131 = vst.msk [vmem:[#allocation3] sm:$0x1] %vm87_vm4, %v130_v48 }
 0x248   :  { %v627_v57 = vld [vmem:[#allocation2] sm:$0x1] }
 0x249   :  { %v629_v56 = vld [vmem:[#allocation3] sm:$0x1]  ;;  %v628_v58 = vsub.f32 0.0, %v627_v57 }
 0x24a   :  { %843 = vrcp.f32 %v629_v56 }
 0x254   :  { %v844_v59 = vpop.eup %843 }
 0x255   :  { %v631_v60 = vmul.f32 %v844_v59, %v628_v58 }
 0x2af   :  { %v616_v49 = vpop.xlane.xlu0 %615 }
 0x2b0   :  { %v617_v50 = vrot.slane %v616_v49, 4 }
 0x2b2   :  { %v618_v51 = vadd.f32 %v617_v50, %v616_v49 }
 0x2b4   :  { %v619_v52 = vrot.slane %v618_v51, 2 }
 0x2b6   :  { %v620_v53 = vadd.f32 %v619_v52, %v618_v51 }
 0x2b8   :  { %v621_v54 = vrot.slane %v620_v53, 1 }
 0x2ba   :  { %v622_v55 = vadd.f32 %v621_v54, %v620_v53 }
 0x2bc   :  { %828 = vpush %v622_v55 }
 0x2ed   :  { %s829_s22 = spop %828 }
 0x2ee   :  { %s626_s23 = smul.f32 0.5, %s829_s22 }
 0x2f0   :  { %s632_s24 = smul.f32 0.001, %s626_s23 }
 0x2f2   :  { %v633_v61 = vstv %s632_s24 }
 0x2f3   :  { %v634_v62 = vadd.f32 %v633_v61, %v631_v60 }
 0x2f5   :  { %635 = vst.msk [vmem:[#allocation14] sm:$0x1] %vm87_vm4, %v634_v62 }
 0x2f6   :  { %956 = shalt.err (!%p953_p13)
}
 0x2f7   :  { %s957_s21 = scalar_lea.hbm %s1237_s5, 16 }
 0x2f8   :  { %p958_p0 = scmp.ne.s32.totalorder %s1237_s5, %s957_s21  ;;  %p961_p1 = scmp.lt.u32.totalorder %s957_s21, %s1237_s5 }
 0x2fa   :  { %p963_p2 = pnand %p961_p1, %p958_p0 }
 0x2fc   :  { %966 = shalt.err (!%p963_p2)
}
 0x2fd   :  { %645 = dma.vmem_to_hbm [thread:$0]  %s643_s26, 16, %s1237_s5, [#allocation6]  }
 0x2fe   :  { %975 = dma.done.wait [#allocation6], 16  }
 0x2ff   :  { %976 = vsyncadd [#allocation6], 4294967280 }
 0x300   :  { %649 = vsyncpa [#allocation5], 1 }
 0x301   :  { %650 = vsyncpa [#allocation9], 1 }
 0x302   :  { %651 = vsyncpa [#allocation13], 1 }
 0x303   :  { %652 = vsyncpa [#allocation6], 1 }
 0x304   :  { %653 = vsyncpa [#allocation7], 1 }

</bundles_post_ra>
